<compile_context>
chip_gen: v6e
topology: v6e:2x2x1
jax: 0.10.0
libtpu: 0.0.40
codegen_flags: <defaults>
</compile_context>

<pallas_src>
import functools

import jax
import jax.numpy as jnp
import numpy as np
from jax.experimental import pallas as pl
from jax.experimental.pallas import tpu as pltpu


# ---------------------------------------------------------------------------
# Kernel
# ---------------------------------------------------------------------------
def _mapping_kernel(x_ref, w_ref, bias_ref, out_ref):
    """out = (scale*W) @ x + bias for one (batch, hw) tile.

    x_ref   : (1, Cin, tile_hw)   activation tile (native NCHW layout)
    w_ref   : (Cout, Cin)         1x1 conv weight with BN scale folded in
    bias_ref: (Cout, 1)           folded BN bias
    out_ref : (1, Cout, tile_hw)
    """
    x = x_ref[0, :, :]                                           # (Cin, tile_hw)
    y = jnp.dot(w_ref[...], x, preferred_element_type=jnp.float32)  # (Cout, tile_hw)
    y = y + bias_ref[...]                                        # per-channel bias
    out_ref[0, :, :] = y.astype(out_ref.dtype)


# ---------------------------------------------------------------------------
# Wrapper
# ---------------------------------------------------------------------------
def mapping_forward(x_nchw, params, *, tile_hw=512, eps=1e-5):
    """Matches Mapping.forward: BatchNorm2d(Conv2d(x, 1x1, bias=False))."""
    N, Cin, H, W = x_nchw.shape
    w = params['w']                                   # (Cout, Cin, 1, 1) OIHW
    Cout = w.shape[0]

    # Fold BN (inference mode) into the conv weight and a per-channel bias.
    #   BN(Wx) = s * (Wx - mean) + beta = (s*W) x + (beta - s*mean)
    scale = (params['gamma'] / jnp.sqrt(params['var'] + eps)).astype(jnp.float32)
    bias = (params['beta'] - params['mean'] * scale).astype(jnp.float32)
    w_scaled = (scale[:, None] * w.reshape(Cout, Cin)).astype(jnp.float32)  # (Cout, Cin)
    bias2 = bias.reshape(Cout, 1)

    # View x as (N, Cin, H*W) -- no transpose, no data movement.
    HW = H * W
    x3 = x_nchw.reshape(N, Cin, HW)

    # Pick a lane-aligned HW tile (multiple of 128, capped at the padded extent).
    hw_aligned = ((HW + 127) // 128) * 128
    tile_hw = max(128, min(int(tile_hw), hw_aligned))
    tile_hw = ((tile_hw + 127) // 128) * 128
    n_hw = pl.cdiv(HW, tile_hw)
    HWp = n_hw * tile_hw
    if HWp != HW:
        x3 = jnp.pad(x3, ((0, 0), (0, 0), (0, HWp - HW)))

    cost = pl.CostEstimate(
        flops=2 * N * HWp * Cin * Cout,
        transcendentals=0,
        bytes_accessed=4 * (N * Cin * HWp + Cout * Cin + Cout + N * Cout * HWp))

    out3 = pl.pallas_call(
        _mapping_kernel,
        out_shape=jax.ShapeDtypeStruct((N, Cout, HWp), x_nchw.dtype),
        grid=(N, n_hw),
        in_specs=[
            pl.BlockSpec((1, Cin, tile_hw), lambda n, j: (n, 0, j)),
            pl.BlockSpec((Cout, Cin), lambda n, j: (0, 0)),
            pl.BlockSpec((Cout, 1), lambda n, j: (0, 0)),
        ],
        out_specs=pl.BlockSpec((1, Cout, tile_hw), lambda n, j: (n, 0, j)),
        compiler_params=pltpu.CompilerParams(
            dimension_semantics=("parallel", "parallel"),
            vmem_limit_bytes=64 * 1024 * 1024),
        cost_estimate=cost,
    )(x3, w_scaled, bias2)

    out = out3[:, :, :HW].reshape(N, Cout, H, W)      # view/slice, no transpose
    return out


# ---------------------------------------------------------------------------
# Main
# ---------------------------------------------------------------------------
if __name__ == "__main__":
    N, Cin, Cout, H, W = 2, 4, 128, 16, 16
    key = jax.random.PRNGKey(0)
    k = jax.random.split(key, 6)

    x = jax.random.normal(k[0], (N, Cin, H, W), jnp.float32)
    w = 0.1 * jax.random.normal(k[1], (Cout, Cin, 1, 1), jnp.float32)
    gamma = 1.0 + 0.1 * jax.random.normal(k[2], (Cout,), jnp.float32)
    beta = 0.1 * jax.random.normal(k[3], (Cout,), jnp.float32)
    mean = 0.1 * jax.random.normal(k[4], (Cout,), jnp.float32)
    var = 1.0 + 0.1 * jax.random.uniform(k[5], (Cout,), jnp.float32)
    params = dict(w=w, gamma=gamma, beta=beta, mean=mean, var=var)

    fwd = jax.jit(functools.partial(mapping_forward, tile_hw=512))
    out = jax.block_until_ready(fwd(x, params))
    assert out.shape == (N, Cout, H, W)

    # Pure-JAX reference (1x1 conv == channel matmul) for correctness.
    def ref_forward(xin, p, eps=1e-5):
        w2 = p['w'].reshape(Cout, Cin)
        y = jnp.einsum('nchw,oc->nohw', xin, w2,
                       precision=jax.lax.Precision.HIGHEST)
        s = p['gamma'] / jnp.sqrt(p['var'] + eps)
        b = p['beta'] - p['mean'] * s
        return y * s[None, :, None, None] + b[None, :, None, None]

    ref = jax.block_until_ready(ref_forward(x, params))
    np.testing.assert_allclose(np.asarray(out), np.asarray(ref),
                               atol=1e-3, rtol=1e-3)
    print("KERNEL_OK")
</pallas_src>

<mosaic_0001>
module attributes {stable_mosaic.version = 11 : i64} {
  func.func @_mapping_kernel(%arg0: i32, %arg1: i32, %arg2: memref<1x4x256xf32, #tpu.memory_space<vmem>>, %arg3: memref<128x4xf32, #tpu.memory_space<vmem>>, %arg4: memref<128x1xf32, #tpu.memory_space<vmem>>, %arg5: memref<1x128x256xf32, #tpu.memory_space<vmem>>) attributes {dimension_semantics = [#tpu.dimension_semantics<parallel>, #tpu.dimension_semantics<parallel>], iteration_bounds = array<i64: 2, 1>, scalar_prefetch = 0 : i64, scratch_operands = 0 : i64, tpu.core_type = #tpu.core_type<tc>, window_params = [{transform_indices = @transform_0, window_bounds = array<i64: 1, 4, 256>}, {pipeline_mode = #tpu.pipeline_mode<synchronous>, transform_indices = @transform_1, window_bounds = array<i64: 128, 4>}, {pipeline_mode = #tpu.pipeline_mode<synchronous>, transform_indices = @transform_2, window_bounds = array<i64: 128, 1>}, {transform_indices = @transform_3, window_bounds = array<i64: 1, 128, 256>}]} {
    %c0 = arith.constant 0 : index
    %c0_0 = arith.constant 0 : index
    %c0_1 = arith.constant 0 : index
    %0 = vector.load %arg2[%c0, %c0_0, %c0_1] : memref<1x4x256xf32, #tpu.memory_space<vmem>>, vector<1x4x256xf32>
    %1 = vector.shape_cast %0 : vector<1x4x256xf32> to vector<4x256xf32>
    %c0_2 = arith.constant 0 : index
    %c0_3 = arith.constant 0 : index
    %2 = vector.load %arg3[%c0_2, %c0_3] : memref<128x4xf32, #tpu.memory_space<vmem>>, vector<128x4xf32>
    %cst = arith.constant dense<0.000000e+00> : vector<128x256xf32>
    %3 = tpu.matmul %2, %1, %cst {dimension_numbers = #tpu.dot_dimension_numbers<[1], [0], [0], [1], [0, 0, 1, 1], [], []>} : vector<128x4xf32>, vector<4x256xf32>, vector<128x256xf32> -> vector<128x256xf32>
    %c0_4 = arith.constant 0 : index
    %c0_5 = arith.constant 0 : index
    %4 = vector.load %arg4[%c0_4, %c0_5] : memref<128x1xf32, #tpu.memory_space<vmem>>, vector<128x1xf32>
    %5 = vector.broadcast %4 : vector<128x1xf32> to vector<128x256xf32>
    %6 = arith.addf %3, %5 : vector<128x256xf32>
    %c0_6 = arith.constant 0 : index
    %c0_7 = arith.constant 0 : index
    %c0_8 = arith.constant 0 : index
    %7 = vector.load %arg5[%c0_6, %c0_7, %c0_8] : memref<1x128x256xf32, #tpu.memory_space<vmem>>, vector<1x128x256xf32>
    %8 = vector.shape_cast %7 : vector<1x128x256xf32> to vector<128x256xf32>
    %9 = vector.shape_cast %6 : vector<128x256xf32> to vector<1x128x256xf32>
    tpu.vector_store %arg5[%c0_6, %c0_7, %c0_8], %9 {strides = array<i32>} : memref<1x128x256xf32, #tpu.memory_space<vmem>>, vector<1x128x256xf32>,
    return
  }
  func.func @transform_0(%arg0: i32, %arg1: i32) -> (i32, i32, i32) {
    %c0_i32 = arith.constant 0 : i32
    %c0_i32_0 = arith.constant 0 : i32
    return %arg0, %c0_i32, %arg1 : i32, i32, i32
  }
  func.func @transform_1(%arg0: i32, %arg1: i32) -> (i32, i32) {
    %c0_i32 = arith.constant 0 : i32
    %c0_i32_0 = arith.constant 0 : i32
    %c0_i32_1 = arith.constant 0 : i32
    return %c0_i32, %c0_i32_0 : i32, i32
  }
  func.func @transform_2(%arg0: i32, %arg1: i32) -> (i32, i32) {
    %c0_i32 = arith.constant 0 : i32
    %c0_i32_0 = arith.constant 0 : i32
    %c0_i32_1 = arith.constant 0 : i32
    return %c0_i32, %c0_i32_0 : i32, i32
  }
  func.func @transform_3(%arg0: i32, %arg1: i32) -> (i32, i32, i32) {
    %c0_i32 = arith.constant 0 : i32
    %c0_i32_0 = arith.constant 0 : i32
    return %arg0, %c0_i32, %arg1 : i32, i32, i32
  }
}

</mosaic_0001>

<bundles_post_ra>
// kernel: mapping_forward.1
= control target key start
LH: loop header
LB: loop body
LE: loop exit
PB: predicated region body
PF: predicated region fallthrough
CT: control target
= control target key end

     0   :  { %s767_s12 = smov 0   ;;  %s769_s13 = smov 0   ;;  %s982_s0 = inlined_call_operand.vmem [shape: f32[2,4,256], index: 0, kind: input, shape index: {}]   ;;  %s983_s1 = inlined_call_operand.vmem [shape: f32[128,4], index: 1, kind: input, shape index: {}]   ;;  %s984_s2 = inlined_call_operand.vmem [shape: f32[128,1], index: 2, kind: input, shape index: {}]   ;;  %s985_s3 = inlined_call_operand.vmem [shape: f32[2,128,256], index: 3, kind: output, shape index: {}]  }
   0x1   :  { %s771_s14 = smov 0  }
   0x2 LB: > { %s25_s15 = sadd.s32 1, %s739_s13  ;;  %p663_p0 = scmp.ge.s32.totalorder %s743_s14, 1  ;;  %s743_s14 = sphi %s771_s14, %s13_s14   ;;  %s739_s13 = sphi %s769_s13, %s987_s13   ;;  %s735_s12 = sphi %s767_s12, %s986_s12  }
   0x3   : > { %p27_p1 = scmp.ge.s32.totalorder %s25_s15, 2  ;;  %p158_p2 = scmp.lt.s32.totalorder %s743_s14, 3 }
   0x5   : > { %s989_s15 = smov (%p27_p1, %s25_s15), 0  ;;  %p159_p3 = pnand %p663_p0, %p158_p2 }
   0x6   : > { %p191_p4 = scmp.lt.s32.totalorder (!%p159_p3), %s735_s12, 1 }
   0x7   : > { %162 = sbr.rel (%p159_p3) target bundleno = 246 (0xf6), region = 32 }
   0xc   : > { %v745_v0 = vmov 0.0   ;;  %s991_s12 = smov (!%p191_p4, %s735_s12), 1  ;;  %v746_v1 = vmov 0   ;;  %v229_v2 = vld [vmem:[%s984_s2 + $0x10] sm:$0xff]  ;;  %vm374_vm0 = vcmask 1043456   ;;  %v227_v4 = vld [vmem:[%s984_s2] sm:$0xff] }
   0xd   : > { %443 = vmatprep.mubr.f32.mxu0 %v745_v0  ;;  %491 = vmatprep.mubr.f32.mxu1 %v745_v0  ;;  %s688_s16 = sshll.u32 %s991_s12, 3  ;;  %v211_v6 = vld [vmem:[%s983_s1] sm:$0xff]  ;;  %vm325_vm1 = vcmask 31744   ;;  %v230_v8 = vld [vmem:[%s984_s2 + $0x18] sm:$0xff]  ;;  %v228_v9 = vld [vmem:[%s984_s2 + $0x8] sm:$0xff]  ;;  %s689_s11 = sshll.u32 %s991_s12, 8 }
   0xe   : > { %719 = vset.pattern.permute.xlu1 %v746_v1  ;;  %718 = vset.pattern.permute.xlu0 %v746_v1  ;;  %s198_s19 = scalar_lea.vmem %s982_s0, %s688_s16  ;;  %v219_v7 = vld [vmem:[%s983_s1 + $0x40] sm:$0xff]  ;;  %v212_v10 = vld [vmem:[%s983_s1 + $0x8] sm:$0xff]  ;;  %v213_v14 = vld [vmem:[%s983_s1 + $0x10] sm:$0xff]  ;;  %s931_s18 = scalar_lea.vmem %s985_s3, %s689_s11 }
   0xf   : > { %v210_v3 = vld [vmem:[%s198_s19] sm:$0xff]  ;;  %255 = vperm.xlu1 %719, %v229_v2   ;;  %245 = vperm.xlu0 %718, %v227_v4   ;;  %v220_v11 = vld [vmem:[%s983_s1 + $0x48] sm:$0xff]  ;;  %v221_v15 = vld [vmem:[%s983_s1 + $0x50] sm:$0xff] }
  0x10   : > { %v324_v5 = vcombine.high %v210_v3, %v210_v3  ;;  %v232_v12 = vld [vmem:[%s984_s2 + $0x28] sm:$0xff]  ;;  %v231_v13 = vld [vmem:[%s984_s2 + $0x20] sm:$0xff]  ;;  %v234_v16 = vld [vmem:[%s984_s2 + $0x38] sm:$0xff] }
  0x11   : > { %v233_v17 = vld [vmem:[%s984_s2 + $0x30] sm:$0xff]  ;;  %v214_v18 = vld [vmem:[%s983_s1 + $0x18] sm:$0xff]  ;;  %v236_v20 = vld [vmem:[%s984_s2 + $0x48] sm:$0xff] }
  0x12   : > { %668 = vmatprep.subr.msk.mxu0 %vm374_vm0, %v324_v5  ;;  %690 = vmatprep.subr.msk.mxu1 %vm374_vm0, %v324_v5  ;;  %v222_v19 = vld [vmem:[%s983_s1 + $0x58] sm:$0xff]  ;;  %v235_v21 = vld [vmem:[%s984_s2 + $0x40] sm:$0xff]  ;;  %v237_v25 = vld [vmem:[%s984_s2 + $0x50] sm:$0xff] }
  0x13   : > { %669 = vmatpush1.msk.msra.mxu0 %vm374_vm0, %v210_v3  ;;  %691 = vmatpush1.msk.msra.mxu1 %vm374_vm0, %v210_v3  ;;  %v215_v22 = vld [vmem:[%s983_s1 + $0x20] sm:$0xff]  ;;  %v238_v24 = vld [vmem:[%s984_s2 + $0x58] sm:$0xff]  ;;  %v216_v26 = vld [vmem:[%s983_s1 + $0x28] sm:$0xff] }
  0x14   : > { %670 = vmatmul.mubr.msk.f32.vlgmr.msra.gmra.mxu0 %vm325_vm1, %v211_v6  ;;  %678 = vmatmul.mubr.msk.f32.vlgmr.msra.gmra.mxu1 %vm325_vm1, %v219_v7  ;;  %v223_v23 = vld [vmem:[%s983_s1 + $0x60] sm:$0xff]  ;;  %v224_v27 = vld [vmem:[%s983_s1 + $0x68] sm:$0xff]  ;;  %v217_v30 = vld [vmem:[%s983_s1 + $0x30] sm:$0xff] }
  0x15   : > { %449 = vmatprep.mubr.f32.mxu0 %v745_v0  ;;  %497 = vmatprep.mubr.f32.mxu1 %v745_v0  ;;  %v240_v28 = vld [vmem:[%s984_s2 + $0x68] sm:$0xff]  ;;  %v239_v29 = vld [vmem:[%s984_s2 + $0x60] sm:$0xff]  ;;  %v225_v31 = vld [vmem:[%s983_s1 + $0x70] sm:$0xff] }
  0x16   : > { %260 = vperm.xlu1 %719, %v230_v8   ;;  %250 = vperm.xlu0 %718, %v228_v9   ;;  %v242_v32 = vld [vmem:[%s984_s2 + $0x78] sm:$0xff]  ;;  %v241_v33 = vld [vmem:[%s984_s2 + $0x70] sm:$0xff] }
  0x17   : > { %v218_v34 = vld [vmem:[%s983_s1 + $0x38] sm:$0xff] }
  0x18   : > { %671 = vmatmul.mubr.msk.f32.gmra.mxu0 %vm325_vm1, %v212_v10  ;;  %679 = vmatmul.mubr.msk.f32.gmra.mxu1 %vm325_vm1, %v220_v11  ;;  %v226_v35 = vld [vmem:[%s983_s1 + $0x78] sm:$0xff] }
  0x19   : > { %455 = vmatprep.mubr.f32.mxu0 %v745_v0  ;;  %503 = vmatprep.mubr.f32.mxu1 %v745_v0 }
  0x1a   : > { %270 = vperm.xlu1 %719, %v232_v12   ;;  %265 = vperm.xlu0 %718, %v231_v13  }
  0x1c   : > { %672 = vmatmul.mubr.msk.f32.gmra.mxu0 %vm325_vm1, %v213_v14  ;;  %680 = vmatmul.mubr.msk.f32.gmra.mxu1 %vm325_vm1, %v221_v15 }
  0x1d   : > { %461 = vmatprep.mubr.f32.mxu0 %v745_v0  ;;  %509 = vmatprep.mubr.f32.mxu1 %v745_v0 }
  0x1e   : > { %280 = vperm.xlu1 %719, %v234_v16   ;;  %275 = vperm.xlu0 %718, %v233_v17  }
  0x20   : > { %673 = vmatmul.mubr.msk.f32.gmra.mxu0 %vm325_vm1, %v214_v18  ;;  %681 = vmatmul.mubr.msk.f32.gmra.mxu1 %vm325_vm1, %v222_v19 }
  0x21   : > { %467 = vmatprep.mubr.f32.mxu0 %v745_v0  ;;  %515 = vmatprep.mubr.f32.mxu1 %v745_v0 }
  0x22   : > { %290 = vperm.xlu1 %719, %v236_v20   ;;  %285 = vperm.xlu0 %718, %v235_v21  }
  0x24   : > { %674 = vmatmul.mubr.msk.f32.gmra.mxu0 %vm325_vm1, %v215_v22  ;;  %682 = vmatmul.mubr.msk.f32.gmra.mxu1 %vm325_vm1, %v223_v23 }
  0x25   : > { %473 = vmatprep.mubr.f32.mxu0 %v745_v0  ;;  %521 = vmatprep.mubr.f32.mxu1 %v745_v0 }
  0x26   : > { %300 = vperm.xlu1 %719, %v238_v24   ;;  %295 = vperm.xlu0 %718, %v237_v25  }
  0x28   : > { %675 = vmatmul.mubr.msk.f32.gmra.mxu0 %vm325_vm1, %v216_v26  ;;  %683 = vmatmul.mubr.msk.f32.gmra.mxu1 %vm325_vm1, %v224_v27 }
  0x29   : > { %479 = vmatprep.mubr.f32.mxu0 %v745_v0  ;;  %527 = vmatprep.mubr.f32.mxu1 %v745_v0 }
  0x2a   : > { %310 = vperm.xlu1 %719, %v240_v28   ;;  %305 = vperm.xlu0 %718, %v239_v29  }
  0x2c   : > { %676 = vmatmul.mubr.msk.f32.gmra.mxu0 %vm325_vm1, %v217_v30  ;;  %684 = vmatmul.mubr.msk.f32.gmra.mxu1 %vm325_vm1, %v225_v31 }
  0x2d   : > { %485 = vmatprep.mubr.f32.mxu0 %v745_v0  ;;  %533 = vmatprep.mubr.f32.mxu1 %v745_v0 }
  0x2e   : > { %320 = vperm.xlu1 %719, %v242_v32   ;;  %315 = vperm.xlu0 %718, %v241_v33  }
  0x30   : > { %677 = vmatmul.mubr.msk.f32.gmra.mxu0 %vm325_vm1, %v218_v34  ;;  %685 = vmatmul.mubr.msk.f32.gmra.mxu1 %vm325_vm1, %v226_v35 }
  0x8a   : > { %v246_v36 = vpop.permute.xlu0 %245  ;;  %v256_v37 = vpop.permute.xlu1 %255 }
  0x91   : > { %v251_v38 = vpop.permute.xlu0 %250  ;;  %v261_v39 = vpop.permute.xlu1 %260 }
  0x95   : > { %v919_v40 = vpop.permute.xlu0 %265  ;;  %v921_v41 = vpop.permute.xlu1 %270 }
  0x99   : > { %v923_v42 = vpop.permute.xlu0 %275  ;;  %v926_v43 = vpop.permute.xlu1 %280 }
  0x9d   : > { %v286_v44 = vpop.permute.xlu0 %285  ;;  %v291_v51 = vpop.permute.xlu1 %290 }
  0xa1   : > { %v296_v60 = vpop.permute.xlu0 %295  ;;  %v301_v5 = vpop.permute.xlu1 %300 }
  0xa5   : > { %v306_v14 = vpop.permute.xlu0 %305  ;;  %v311_v23 = vpop.permute.xlu1 %310 }
  0xa9   : > { %v316_v32 = vpop.permute.xlu0 %315 }
  0xd4   : > { %v445_v45 = vpop.f32.mrf.mxu0  ;;  %v493_v46 = vpop.f32.mrf.mxu1 }
  0xd5   : > { %v446_v47 = vadd.f32 %v445_v45, %v246_v36  ;;  %v494_v48 = vadd.f32 %v493_v46, %v286_v44 }
  0xd6   : > { %v447_v49 = vpop.f32.mrf.mxu0  ;;  %v495_v50 = vpop.f32.mrf.mxu1 }
  0xd7   : > { %540 = vst [vmem:[%s931_s18] sm:$0xff] %v446_v47  ;;  %556 = vst [vmem:[%s931_s18 + $0x80] sm:$0xff] %v494_v48  ;;  %v448_v52 = vadd.f32 %v447_v49, %v246_v36  ;;  %v496_v53 = vadd.f32 %v495_v50, %v286_v44  ;;  %v321_v44 = vpop.permute.xlu1 %320 }
  0xd8   : > { %v451_v54 = vpop.f32.mrf.mxu0  ;;  %v499_v55 = vpop.f32.mrf.mxu1 }
  0xd9   : > { %541 = vst [vmem:[%s931_s18 + $0x8] sm:$0xff] %v448_v52  ;;  %557 = vst [vmem:[%s931_s18 + $0x88] sm:$0xff] %v496_v53  ;;  %v452_v56 = vadd.f32 %v451_v54, %v251_v38  ;;  %v500_v57 = vadd.f32 %v499_v55, %v291_v51 }
  0xda   : > { %v453_v58 = vpop.f32.mrf.mxu0  ;;  %v501_v59 = vpop.f32.mrf.mxu1 }
  0xdb   : > { %542 = vst [vmem:[%s931_s18 + $0x10] sm:$0xff] %v452_v56  ;;  %558 = vst [vmem:[%s931_s18 + $0x90] sm:$0xff] %v500_v57  ;;  %v454_v61 = vadd.f32 %v453_v58, %v251_v38  ;;  %v502_v62 = vadd.f32 %v501_v59, %v291_v51 }
  0xdc   : > { %v457_v63 = vpop.f32.mrf.mxu0  ;;  %v505_v0 = vpop.f32.mrf.mxu1 }
  0xdd   : > { %543 = vst [vmem:[%s931_s18 + $0x18] sm:$0xff] %v454_v61  ;;  %559 = vst [vmem:[%s931_s18 + $0x98] sm:$0xff] %v502_v62  ;;  %v458_v1 = vadd.f32 %v457_v63, %v256_v37  ;;  %v506_v2 = vadd.f32 %v505_v0, %v296_v60 }
  0xde   : > { %v459_v3 = vpop.f32.mrf.mxu0  ;;  %v507_v4 = vpop.f32.mrf.mxu1 }
  0xdf   : > { %544 = vst [vmem:[%s931_s18 + $0x20] sm:$0xff] %v458_v1  ;;  %560 = vst [vmem:[%s931_s18 + $0xa0] sm:$0xff] %v506_v2  ;;  %v460_v6 = vadd.f32 %v459_v3, %v256_v37  ;;  %v508_v7 = vadd.f32 %v507_v4, %v296_v60 }
  0xe0   : > { %v463_v8 = vpop.f32.mrf.mxu0  ;;  %v511_v9 = vpop.f32.mrf.mxu1 }
  0xe1   : > { %545 = vst [vmem:[%s931_s18 + $0x28] sm:$0xff] %v460_v6  ;;  %561 = vst [vmem:[%s931_s18 + $0xa8] sm:$0xff] %v508_v7  ;;  %v464_v10 = vadd.f32 %v463_v8, %v261_v39  ;;  %v512_v11 = vadd.f32 %v511_v9, %v301_v5 }
  0xe2   : > { %v465_v12 = vpop.f32.mrf.mxu0  ;;  %v513_v13 = vpop.f32.mrf.mxu1 }
  0xe3   : > { %546 = vst [vmem:[%s931_s18 + $0x30] sm:$0xff] %v464_v10  ;;  %562 = vst [vmem:[%s931_s18 + $0xb0] sm:$0xff] %v512_v11  ;;  %v466_v15 = vadd.f32 %v465_v12, %v261_v39  ;;  %v514_v16 = vadd.f32 %v513_v13, %v301_v5 }
  0xe4   : > { %v469_v17 = vpop.f32.mrf.mxu0  ;;  %v517_v18 = vpop.f32.mrf.mxu1 }
  0xe5   : > { %547 = vst [vmem:[%s931_s18 + $0x38] sm:$0xff] %v466_v15  ;;  %563 = vst [vmem:[%s931_s18 + $0xb8] sm:$0xff] %v514_v16  ;;  %v470_v19 = vadd.f32 %v469_v17, %v919_v40  ;;  %v518_v20 = vadd.f32 %v517_v18, %v306_v14 }
  0xe6   : > { %v471_v21 = vpop.f32.mrf.mxu0  ;;  %v519_v22 = vpop.f32.mrf.mxu1 }
  0xe7   : > { %548 = vst [vmem:[%s931_s18 + $0x40] sm:$0xff] %v470_v19  ;;  %564 = vst [vmem:[%s931_s18 + $0xc0] sm:$0xff] %v518_v20  ;;  %v472_v24 = vadd.f32 %v471_v21, %v919_v40  ;;  %v520_v25 = vadd.f32 %v519_v22, %v306_v14 }
  0xe8   : > { %v475_v26 = vpop.f32.mrf.mxu0  ;;  %v523_v27 = vpop.f32.mrf.mxu1 }
  0xe9   : > { %549 = vst [vmem:[%s931_s18 + $0x48] sm:$0xff] %v472_v24  ;;  %565 = vst [vmem:[%s931_s18 + $0xc8] sm:$0xff] %v520_v25  ;;  %v476_v28 = vadd.f32 %v475_v26, %v921_v41  ;;  %v524_v29 = vadd.f32 %v523_v27, %v311_v23 }
  0xea   : > { %v477_v30 = vpop.f32.mrf.mxu0  ;;  %v525_v31 = vpop.f32.mrf.mxu1 }
  0xeb   : > { %550 = vst [vmem:[%s931_s18 + $0x50] sm:$0xff] %v476_v28  ;;  %566 = vst [vmem:[%s931_s18 + $0xd0] sm:$0xff] %v524_v29  ;;  %v478_v33 = vadd.f32 %v477_v30, %v921_v41  ;;  %v526_v34 = vadd.f32 %v525_v31, %v311_v23 }
  0xec   : > { %v481_v35 = vpop.f32.mrf.mxu0  ;;  %v529_v36 = vpop.f32.mrf.mxu1 }
  0xed   : > { %551 = vst [vmem:[%s931_s18 + $0x58] sm:$0xff] %v478_v33  ;;  %567 = vst [vmem:[%s931_s18 + $0xd8] sm:$0xff] %v526_v34  ;;  %v482_v37 = vadd.f32 %v481_v35, %v923_v42  ;;  %v530_v38 = vadd.f32 %v529_v36, %v316_v32 }
  0xee   : > { %v483_v39 = vpop.f32.mrf.mxu0  ;;  %v531_v40 = vpop.f32.mrf.mxu1 }
  0xef   : > { %552 = vst [vmem:[%s931_s18 + $0x60] sm:$0xff] %v482_v37  ;;  %568 = vst [vmem:[%s931_s18 + $0xe0] sm:$0xff] %v530_v38  ;;  %v484_v41 = vadd.f32 %v483_v39, %v923_v42  ;;  %v532_v45 = vadd.f32 %v531_v40, %v316_v32 }
  0xf0   : > { %v487_v46 = vpop.f32.mrf.mxu0  ;;  %v535_v47 = vpop.f32.mrf.mxu1 }
  0xf1   : > { %553 = vst [vmem:[%s931_s18 + $0x68] sm:$0xff] %v484_v41  ;;  %569 = vst [vmem:[%s931_s18 + $0xe8] sm:$0xff] %v532_v45  ;;  %v488_v48 = vadd.f32 %v487_v46, %v926_v43  ;;  %v536_v49 = vadd.f32 %v535_v47, %v321_v44 }
  0xf2   : > { %v489_v50 = vpop.f32.mrf.mxu0  ;;  %v537_v51 = vpop.f32.mrf.mxu1 }
  0xf3   : > { %554 = vst [vmem:[%s931_s18 + $0x70] sm:$0xff] %v488_v48  ;;  %570 = vst [vmem:[%s931_s18 + $0xf0] sm:$0xff] %v536_v49  ;;  %v490_v52 = vadd.f32 %v489_v50, %v926_v43  ;;  %v538_v53 = vadd.f32 %v537_v51, %v321_v44 }
  0xf5   : > { %555 = vst [vmem:[%s931_s18 + $0x78] sm:$0xff] %v490_v52  ;;  %571 = vst [vmem:[%s931_s18 + $0xf8] sm:$0xff] %v538_v53 }
  0xf6 PF: > { %s13_s14 = sadd.s32 1, %s743_s14   ;;  %s986_s12 = smov %s739_s13 }
  0xf7   : > { %p10_p5 = scmp.ge.s32.totalorder %s13_s14, 4   ;;  %s987_s13 = smov %s989_s15 }
  0xf9   :  { %12 = sbr.rel (!%p10_p5) target bundleno = 2 (0x2), region = 62 }

</bundles_post_ra>
